<compile_context>
chip_gen: v5e
topology: v5e:2x2
jax: 0.10.0
libtpu: 0.0.40
codegen_flags: <defaults>
</compile_context>

<pallas_src>
import functools

import jax
import jax.numpy as jnp
from jax import lax
from jax.experimental import pallas as pl
from jax.experimental.pallas import tpu as pltpu


LANE = 128      # lane width (last-dim multiple for lane-dense stores)
SUBLANE = 8     # sublane multiple (second-to-last dim)


def _round_up(x, m):
    return -(-x // m) * m


def _cdiv(a, b):
    return -(-a // b)


@functools.lru_cache(maxsize=1)
def _vmem_limit_bytes():
    """Per-generation VMEM limit with headroom for internal scratch."""
    try:
        cap = int(pltpu.get_tpu_info().vmem_capacity_bytes)
    except Exception:
        cap = 64 * 1024 * 1024          # conservative fallback (v7x per-TC VMEM)
    return int(cap * 0.8)               # ~51 MiB on v7x, ~102 MiB on v5e/v6e


def _select_tiling(B, N, d_pad, o_pad, itemsize, tile_budget, batch_pad_is_free):
    """Pick (tm rows per tile, bb batches per tile, n_pad) fitting the VMEM budget."""
    n8 = _round_up(N, SUBLANE)
    weight_bytes = d_pad * o_pad * itemsize            # Buffered(1): single copy
    choice = None
    for target in (1024, 512, 256, 128):               # adaptive row-tile target
        if n8 <= target:
            # Small sets: pack whole batches along the sublane axis.
            tm, n_pad = n8, n8
            bb = min(B, max(1, target // n8))
            if not batch_pad_is_free:
                # Avoiding batch-axis padding saves a full HBM round-trip of x;
                # prefer a divisor of B unless it collapses the tile too much.
                best_div = 1
                for cand in range(bb, 0, -1):
                    if B % cand == 0:
                        best_div = cand
                        break
                if best_div * 2 >= bb or best_div * n8 >= 64:
                    bb = best_div
        else:
            # Large sets: tile rows of one set; choose tm to minimize N padding
            # (N=257 -> one 264-row tile, not a 512-row tile with 50% waste).
            k = _cdiv(N, target)
            tm = _round_up(_cdiv(N, k), SUBLANE)
            n_pad = k * tm
            bb = 1
        step_bytes = (2 * bb * tm * (d_pad + o_pad) * itemsize   # x/out double-buffered
                      + weight_bytes
                      + 4 * bb * o_pad * 4)                      # cb blocks (f32)
        choice = (tm, bb, n_pad)
        if step_bytes <= tile_budget:
            return choice
    # TODO(synk): for very large D*O where even one weight copy busts VMEM,
    # tile the O axis (third grid dim) and/or cast weights to bf16.
    return choice


# ---------------------------------------------------------------------------
# Kernel 1 (prologue): per-batch-group combined bias
#     cb[b] = bg - (max_n x[b, n, :]) @ Wl^T
# Grid: (B_pad // bb, n_pad // tm); running per-batch maxes kept in a VMEM
# scratch across the row axis (init at m == 0, finalize at the last m).
# ---------------------------------------------------------------------------
def _combined_bias_kernel(x_ref, wl_ref, bg_ref, cb_ref, xm_sc, *,
                          n_valid, block_rows, rows_padded):
    m = pl.program_id(1)
    last = pl.num_programs(1) - 1

    @pl.when(m == 0)
    def _():
        xm_sc[...] = jnp.full_like(xm_sc, -jnp.inf)

    if rows_padded:
        # Only the last row tile can contain zero-padded set rows; keep the
        # iota/compare/select off the hot tiles.
        @pl.when(m != last)
        def _():
            xm_sc[...] = jnp.maximum(
                xm_sc[...], jnp.max(x_ref[...].astype(jnp.float32), axis=1))

        @pl.when(m == last)
        def _():
            x = x_ref[...].astype(jnp.float32)                   # (bb, tm, D_pad)
            row = m * block_rows + lax.broadcasted_iota(jnp.int32, x.shape, 1)
            x = jnp.where(row < n_valid, x, -jnp.inf)
            xm_sc[...] = jnp.maximum(xm_sc[...], jnp.max(x, axis=1))
    else:
        xm_sc[...] = jnp.maximum(
            xm_sc[...], jnp.max(x_ref[...].astype(jnp.float32), axis=1))

    @pl.when(m == last)
    def _():
        lam = jnp.dot(xm_sc[...].astype(wl_ref.dtype), wl_ref[...],
                      preferred_element_type=jnp.float32)        # (bb, O_pad)
        cb_ref[...] = (bg_ref[...].astype(jnp.float32) - lam)[:, None, :]


# ---------------------------------------------------------------------------
# Kernel 2 (main): out = x @ Wg^T + cb[batch]   -- the heavy, MXU-bound part.
# Each grid step processes a (bb, tm, D_pad) slab: bb whole batches packed
# along the sublane axis (small N) or tm-row slices of one batch (large N).
# ---------------------------------------------------------------------------
def _gamma_kernel(x_ref, wg_ref, cb_ref, o_ref):
    bb, tm, d_pad = x_ref.shape
    o_pad = o_ref.shape[-1]
    # tm is a multiple of 8 and d_pad/o_pad multiples of 128, so these
    # reshapes do not cross (8, 128) tile boundaries (no relayout copies).
    x2 = x_ref[...].reshape(bb * tm, d_pad)
    g = jnp.dot(x2, wg_ref[...], preferred_element_type=jnp.float32)
    g = g.reshape(bb, tm, o_pad) + cb_ref[...]                   # cb: (bb, 1, O_pad) f32
    o_ref[...] = g.astype(o_ref.dtype)


@functools.partial(jax.jit, static_argnames=("use_bf16",))
def perm_equi2_max(x, wg, bg, wl, use_bf16=False):
    """x: (B, N, D).  wg, wl: (out_dim, in_dim) as in torch.nn.Linear.  bg: (out_dim,)."""
    B, N, D = x.shape
    O = wg.shape[0]
    out_dtype = x.dtype
    if N == 0:                                           # empty set: nothing to do
        return jnp.zeros((B, 0, O), out_dtype)

    # Compute dtype: pass use_bf16=True to halve HBM traffic / use the bf16 MXU
    # path on v6e/v7x (accumulation stays f32 via preferred_element_type).
    dt = jnp.bfloat16 if use_bf16 else x.dtype
    itemsize = jnp.dtype(dt).itemsize

    d_pad = _round_up(D, LANE)
    o_pad = _round_up(O, LANE)

    vmem_limit = _vmem_limit_bytes()
    batch_pad_is_free = (d_pad != D) or (_round_up(N, SUBLANE) != N)
    tm, bb, n_pad = _select_tiling(B, N, d_pad, o_pad, itemsize,
                                   tile_budget=int(vmem_limit * 0.75),
                                   batch_pad_is_free=batch_pad_is_free)
    b_pad = _round_up(B, bb)

    # Parameters: transpose + lane-pad once, outside the kernels (tiny).
    def _prep_weight(w):
        wt = w.T.astype(dt)
        if (d_pad, o_pad) == (D, O):
            return wt
        return jnp.zeros((d_pad, o_pad), dt).at[:D, :O].set(wt)

    wg_t = _prep_weight(wg)
    wl_t = _prep_weight(wl)
    if o_pad == O:
        bg_p = bg.astype(jnp.float32).reshape(1, O)
    else:
        bg_p = jnp.zeros((1, o_pad), jnp.float32).at[0, :O].set(bg.astype(jnp.float32))

    # Fast path: skip the extra HBM round-trip of x when no axis needs padding.
    x_c = x.astype(dt) if dt != x.dtype else x
    if (b_pad, n_pad, d_pad) == (B, N, D):
        x_p = x_c
    else:
        x_p = jnp.zeros((b_pad, n_pad, d_pad), dt).at[:B, :N, :D].set(x_c)

    weight_spec = pl.BlockSpec((d_pad, o_pad), lambda i, m: (0, 0),
                               pipeline_mode=pl.Buffered(1))   # constant -> 1 copy

    # ---- Phase 1: combined per-batch bias  cb = bg - Lambda(max_n x) ----
    rows_padded = n_pad != N
    cb = pl.pallas_call(
        functools.partial(_combined_bias_kernel, n_valid=N, block_rows=tm,
                          rows_padded=rows_padded),
        out_shape=jax.ShapeDtypeStruct((b_pad, 1, o_pad), jnp.float32),
        grid_spec=pltpu.PrefetchScalarGridSpec(
            num_scalar_prefetch=0,
            grid=(b_pad // bb, n_pad // tm),
            in_specs=[
                pl.BlockSpec((bb, tm, d_pad), lambda i, m: (i, m, 0)),
                weight_spec,
                pl.BlockSpec((1, o_pad), lambda i, m: (0, 0)),
            ],
            out_specs=pl.BlockSpec((bb, 1, o_pad), lambda i, m: (i, 0, 0)),
            scratch_shapes=[pltpu.VMEM((bb, d_pad), jnp.float32)],
        ),
        compiler_params=pltpu.CompilerParams(
            dimension_semantics=("parallel", "arbitrary"),
            vmem_limit_bytes=vmem_limit,
        ),
    )(x_p, wl_t, bg_p)

    # ---- Phase 2: out = x @ Wg^T + cb  (tiled, lane-dense output stores) ----
    # TODO(synk): when O << D, the second full read of x could be avoided by
    # emitting the per-batch maxes from this kernel and applying -max@Wl^T in a
    # cheap epilogue over the (B, N, O) output.
    out_p = pl.pallas_call(
        _gamma_kernel,
        out_shape=jax.ShapeDtypeStruct((b_pad, n_pad, o_pad), out_dtype),
        grid_spec=pltpu.PrefetchScalarGridSpec(
            num_scalar_prefetch=0,
            grid=(b_pad // bb, n_pad // tm),
            in_specs=[
                pl.BlockSpec((bb, tm, d_pad), lambda i, m: (i, m, 0)),
                weight_spec,
                pl.BlockSpec((bb, 1, o_pad), lambda i, m: (i, 0, 0)),
            ],
            out_specs=pl.BlockSpec((bb, tm, o_pad), lambda i, m: (i, m, 0)),
        ),
        compiler_params=pltpu.CompilerParams(
            dimension_semantics=("parallel", "parallel"),
            vmem_limit_bytes=vmem_limit,
        ),
    )(x_p, wg_t, cb)

    if (b_pad, n_pad, o_pad) == (B, N, O):
        return out_p                       # fast path: no output copy
    return out_p[:B, :N, :O]


if __name__ == "__main__":
    key = jax.random.PRNGKey(0)
    B, N = 2, 8               # batch, set size
    in_dim, out_dim = 32, 32

    kx, kwg, kbg, kwl = jax.random.split(key, 4)
    x = jax.random.normal(kx, (B, N, in_dim), dtype=jnp.float32)
    # Deterministic parameters (shapes match nn.Linear(in_dim, out_dim)).
    wg = jax.random.normal(kwg, (out_dim, in_dim), dtype=jnp.float32) * 0.1
    bg = jax.random.normal(kbg, (out_dim,), dtype=jnp.float32) * 0.1
    wl = jax.random.normal(kwl, (out_dim, in_dim), dtype=jnp.float32) * 0.1

    out = perm_equi2_max(x, wg, bg, wl)
    out = jax.block_until_ready(out)

    # Pure-JAX reference.
    xm = jnp.max(x, axis=1, keepdims=True)
    ref = (x @ wg.T + bg) - (xm @ wl.T)
    assert out.shape == (B, N, out_dim)
    assert jnp.allclose(out, ref, atol=1e-5, rtol=1e-5), "mismatch vs reference"

    print("KERNEL_OK")
</pallas_src>

<mosaic_0001>
module attributes {stable_mosaic.version = 11 : i64} {
  func.func @_gamma_kernel(%arg0: i32, %arg1: i32, %arg2: memref<2x8x128xf32, #tpu.memory_space<vmem>>, %arg3: memref<128x128xf32, #tpu.memory_space<vmem>>, %arg4: memref<2x1x128xf32, #tpu.memory_space<vmem>>, %arg5: memref<2x8x128xf32, #tpu.memory_space<vmem>>) attributes {dimension_semantics = [#tpu.dimension_semantics<parallel>, #tpu.dimension_semantics<parallel>], iteration_bounds = array<i64: 1, 1>, scalar_prefetch = 0 : i64, scratch_operands = 0 : i64, tpu.core_type = #tpu.core_type<tc>, window_params = [{transform_indices = @transform_0, window_bounds = array<i64: 2, 8, 128>}, {pipeline_mode = #tpu.pipeline_mode<synchronous>, transform_indices = @transform_1, window_bounds = array<i64: 128, 128>}, {transform_indices = @transform_2, window_bounds = array<i64: 2, 1, 128>}, {transform_indices = @transform_3, window_bounds = array<i64: 2, 8, 128>}]} {
    %c0 = arith.constant 0 : index
    %c0_0 = arith.constant 0 : index
    %c0_1 = arith.constant 0 : index
    %0 = vector.load %arg2[%c0, %c0_0, %c0_1] : memref<2x8x128xf32, #tpu.memory_space<vmem>>, vector<2x8x128xf32>
    %1 = vector.shape_cast %0 : vector<2x8x128xf32> to vector<16x128xf32>
    %c0_2 = arith.constant 0 : index
    %c0_3 = arith.constant 0 : index
    %2 = vector.load %arg3[%c0_2, %c0_3] : memref<128x128xf32, #tpu.memory_space<vmem>>, vector<128x128xf32>
    %cst = arith.constant dense<0.000000e+00> : vector<16x128xf32>
    %3 = tpu.matmul %1, %2, %cst {dimension_numbers = #tpu.dot_dimension_numbers<[1], [0], [0], [1], [0, 0, 1, 1], [], []>} : vector<16x128xf32>, vector<128x128xf32>, vector<16x128xf32> -> vector<16x128xf32>
    %4 = vector.shape_cast %3 : vector<16x128xf32> to vector<2x8x128xf32>
    %c0_4 = arith.constant 0 : index
    %c0_5 = arith.constant 0 : index
    %c0_6 = arith.constant 0 : index
    %5 = vector.load %arg4[%c0_4, %c0_5, %c0_6] : memref<2x1x128xf32, #tpu.memory_space<vmem>>, vector<2x1x128xf32>
    %6 = vector.broadcast %5 : vector<2x1x128xf32> to vector<2x8x128xf32>
    %7 = arith.addf %4, %6 : vector<2x8x128xf32>
    %c0_7 = arith.constant 0 : index
    %c0_8 = arith.constant 0 : index
    %c0_9 = arith.constant 0 : index
    %8 = vector.load %arg5[%c0_7, %c0_8, %c0_9] : memref<2x8x128xf32, #tpu.memory_space<vmem>>, vector<2x8x128xf32>
    tpu.vector_store %arg5[%c0_7, %c0_8, %c0_9], %7 {strides = array<i32>} : memref<2x8x128xf32, #tpu.memory_space<vmem>>, vector<2x8x128xf32>,
    return
  }
  func.func @transform_0(%arg0: i32, %arg1: i32) -> (i32, i32, i32) {
    %c0_i32 = arith.constant 0 : i32
    %c0_i32_0 = arith.constant 0 : i32
    return %arg0, %arg1, %c0_i32 : i32, i32, i32
  }
  func.func @transform_1(%arg0: i32, %arg1: i32) -> (i32, i32) {
    %c0_i32 = arith.constant 0 : i32
    %c0_i32_0 = arith.constant 0 : i32
    %c0_i32_1 = arith.constant 0 : i32
    return %c0_i32, %c0_i32_0 : i32, i32
  }
  func.func @transform_2(%arg0: i32, %arg1: i32) -> (i32, i32, i32) {
    %c0_i32 = arith.constant 0 : i32
    %c0_i32_0 = arith.constant 0 : i32
    %c0_i32_1 = arith.constant 0 : i32
    return %arg0, %c0_i32, %c0_i32_0 : i32, i32, i32
  }
  func.func @transform_3(%arg0: i32, %arg1: i32) -> (i32, i32, i32) {
    %c0_i32 = arith.constant 0 : i32
    %c0_i32_0 = arith.constant 0 : i32
    return %arg0, %arg1, %c0_i32 : i32, i32, i32
  }
}

module attributes {stable_mosaic.version = 11 : i64} {
  func.func @_combined_bias_kernel(%arg0: i32, %arg1: i32, %arg2: memref<2x8x128xf32, #tpu.memory_space<vmem>>, %arg3: memref<128x128xf32, #tpu.memory_space<vmem>>, %arg4: memref<1x128xf32, #tpu.memory_space<vmem>>, %arg5: memref<2x1x128xf32, #tpu.memory_space<vmem>>, %arg6: memref<2x128xf32, #tpu.memory_space<vmem>>) attributes {dimension_semantics = [#tpu.dimension_semantics<parallel>, #tpu.dimension_semantics<arbitrary>], iteration_bounds = array<i64: 1, 1>, scalar_prefetch = 0 : i64, scratch_operands = 1 : i64, tpu.core_type = #tpu.core_type<tc>, window_params = [{transform_indices = @transform_0, window_bounds = array<i64: 2, 8, 128>}, {pipeline_mode = #tpu.pipeline_mode<synchronous>, transform_indices = @transform_1, window_bounds = array<i64: 128, 128>}, {pipeline_mode = #tpu.pipeline_mode<synchronous>, transform_indices = @transform_2, window_bounds = array<i64: 1, 128>}, {transform_indices = @transform_3, window_bounds = array<i64: 2, 1, 128>}]} {
    %c0_i32 = arith.constant 0 : i32
    %0 = arith.cmpi eq, %arg1, %c0_i32 : i32
    %1 = arith.extui %0 : i1 to i32
    %c0_i32_0 = arith.constant 0 : i32
    %2 = arith.cmpi ne, %1, %c0_i32_0 : i32
    scf.if %2 {
      %cst_9 = arith.constant 0xFF800000 : f32
      %11 = vector.broadcast %cst_9 : f32 to vector<2x128xf32>
      %c0_10 = arith.constant 0 : index
      %c0_11 = arith.constant 0 : index
      %12 = vector.load %arg6[%c0_10, %c0_11] : memref<2x128xf32, #tpu.memory_space<vmem>>, vector<2x128xf32>
      tpu.vector_store %arg6[%c0_10, %c0_11], %11 {strides = array<i32>} : memref<2x128xf32, #tpu.memory_space<vmem>>, vector<2x128xf32>,
    } else {
    }
    %c0 = arith.constant 0 : index
    %c0_1 = arith.constant 0 : index
    %3 = vector.load %arg6[%c0, %c0_1] : memref<2x128xf32, #tpu.memory_space<vmem>>, vector<2x128xf32>
    %c0_2 = arith.constant 0 : index
    %c0_3 = arith.constant 0 : index
    %c0_4 = arith.constant 0 : index
    %4 = vector.load %arg2[%c0_2, %c0_3, %c0_4] : memref<2x8x128xf32, #tpu.memory_space<vmem>>, vector<2x8x128xf32>
    %cst = arith.constant dense<0xFF800000> : vector<2x128xf32>
    %5 = vector.multi_reduction <maximumf>, %4, %cst [1] : vector<2x8x128xf32> to vector<2x128xf32>
    %6 = arith.maximumf %3, %5 : vector<2x128xf32>
    %c0_5 = arith.constant 0 : index
    %c0_6 = arith.constant 0 : index
    %7 = vector.load %arg6[%c0_5, %c0_6] : memref<2x128xf32, #tpu.memory_space<vmem>>, vector<2x128xf32>
    tpu.vector_store %arg6[%c0_5, %c0_6], %6 {strides = array<i32>} : memref<2x128xf32, #tpu.memory_space<vmem>>, vector<2x128xf32>,
    %c0_i32_7 = arith.constant 0 : i32
    %8 = arith.cmpi eq, %arg1, %c0_i32_7 : i32
    %9 = arith.extui %8 : i1 to i32
    %c0_i32_8 = arith.constant 0 : i32
    %10 = arith.cmpi ne, %9, %c0_i32_8 : i32
    scf.if %10 {
      %c0_9 = arith.constant 0 : index
      %c0_10 = arith.constant 0 : index
      %11 = vector.load %arg6[%c0_9, %c0_10] : memref<2x128xf32, #tpu.memory_space<vmem>>, vector<2x128xf32>
      %c0_11 = arith.constant 0 : index
      %c0_12 = arith.constant 0 : index
      %12 = vector.load %arg3[%c0_11, %c0_12] : memref<128x128xf32, #tpu.memory_space<vmem>>, vector<128x128xf32>
      %cst_13 = arith.constant dense<0.000000e+00> : vector<2x128xf32>
      %13 = tpu.matmul %11, %12, %cst_13 {dimension_numbers = #tpu.dot_dimension_numbers<[1], [0], [0], [1], [0, 0, 1, 1], [], []>} : vector<2x128xf32>, vector<128x128xf32>, vector<2x128xf32> -> vector<2x128xf32>
      %c0_14 = arith.constant 0 : index
      %c0_15 = arith.constant 0 : index
      %14 = vector.load %arg4[%c0_14, %c0_15] : memref<1x128xf32, #tpu.memory_space<vmem>>, vector<1x128xf32>
      %15 = vector.broadcast %14 : vector<1x128xf32> to vector<2x128xf32>
      %16 = arith.subf %15, %13 : vector<2x128xf32>
      %17 = vector.shape_cast %16 : vector<2x128xf32> to vector<2x1x128xf32>
      %c0_16 = arith.constant 0 : index
      %c0_17 = arith.constant 0 : index
      %c0_18 = arith.constant 0 : index
      %18 = vector.load %arg5[%c0_16, %c0_17, %c0_18] : memref<2x1x128xf32, #tpu.memory_space<vmem>>, vector<2x1x128xf32>
      tpu.vector_store %arg5[%c0_16, %c0_17, %c0_18], %17 {strides = array<i32>} : memref<2x1x128xf32, #tpu.memory_space<vmem>>, vector<2x1x128xf32>,
    } else {
    }
    return
  }
  func.func @transform_0(%arg0: i32, %arg1: i32) -> (i32, i32, i32) {
    %c0_i32 = arith.constant 0 : i32
    %c0_i32_0 = arith.constant 0 : i32
    return %arg0, %arg1, %c0_i32 : i32, i32, i32
  }
  func.func @transform_1(%arg0: i32, %arg1: i32) -> (i32, i32) {
    %c0_i32 = arith.constant 0 : i32
    %c0_i32_0 = arith.constant 0 : i32
    %c0_i32_1 = arith.constant 0 : i32
    return %c0_i32, %c0_i32_0 : i32, i32
  }
  func.func @transform_2(%arg0: i32, %arg1: i32) -> (i32, i32) {
    %c0_i32 = arith.constant 0 : i32
    %c0_i32_0 = arith.constant 0 : i32
    %c0_i32_1 = arith.constant 0 : i32
    return %c0_i32, %c0_i32_0 : i32, i32
  }
  func.func @transform_3(%arg0: i32, %arg1: i32) -> (i32, i32, i32) {
    %c0_i32 = arith.constant 0 : i32
    %c0_i32_0 = arith.constant 0 : i32
    %c0_i32_1 = arith.constant 0 : i32
    return %arg0, %c0_i32, %c0_i32_0 : i32, i32, i32
  }
}

</mosaic_0001>

<bundles_post_ra>
// kernel: perm_equi2_max.3
= control target key start
LH: loop header
LB: loop body
LE: loop exit
PB: predicated region body
PF: predicated region fallthrough
CT: control target
= control target key end

     0   :  { %s219_s0 = inlined_call_operand.vmem [shape: f32[2,8,128], index: 0, kind: input, shape index: {}]   ;;  %s220_s1 = inlined_call_operand.vmem [shape: f32[128,128], index: 1, kind: input, shape index: {}]   ;;  %s221_s2 = inlined_call_operand.vmem [shape: f32[2,1,128], index: 2, kind: input, shape index: {}]   ;;  %s222_s3 = inlined_call_operand.hbm [shape: f32[2,8,128], index: 3, kind: output, shape index: {}]  }
   0x1   :  { %v32_v0 = vld [vmem:[%s220_s1 + $0x78] sm:$0xff]  ;;  %v31_v1 = vld [vmem:[%s220_s1 + $0x70] sm:$0xff]  ;;  %v30_v2 = vld [vmem:[%s220_s1 + $0x68] sm:$0xff] }
   0x2   :  { %33 = vmatpush.msra.mxu0 %v32_v0  ;;  %86 = vmatpush.msra.mxu1 %v32_v0  ;;  %v29_v3 = vld [vmem:[%s220_s1 + $0x60] sm:$0xff]  ;;  %v28_v4 = vld [vmem:[%s220_s1 + $0x58] sm:$0xff] }
   0x4   :  { %34 = vmatpush.msra.mxu0 %v31_v1  ;;  %87 = vmatpush.msra.mxu1 %v31_v1 }
   0x6   :  { %35 = vmatpush.msra.mxu0 %v30_v2  ;;  %88 = vmatpush.msra.mxu1 %v30_v2 }
   0x7   :  { %8 = vsyncpa [#allocation3], 0  ;;  %v27_v5 = vld [vmem:[%s220_s1 + $0x50] sm:$0xff]  ;;  %v26_v6 = vld [vmem:[%s220_s1 + $0x48] sm:$0xff]  ;;  %s133_s24 = smov [#allocation2]   ;;  %s74_s28 = sshll.u32 %s222_s3, 4  ;;  %s75_s28 = int_to_ptr.hbm [resolvable:$true] %s74_s28 }
   0x8   :  { %36 = vmatpush.msra.mxu0 %v29_v3  ;;  %89 = vmatpush.msra.mxu1 %v29_v3  ;;  %v25_v7 = vld [vmem:[%s220_s1 + $0x40] sm:$0xff]  ;;  %v24_v8 = vld [vmem:[%s220_s1 + $0x38] sm:$0xff]  ;;  %v23_v9 = vld [vmem:[%s220_s1 + $0x30] sm:$0xff]  ;;  %s72_s25 = sshll.u32 %s133_s24, 4  ;;  %s135_s29 = smov 8   ;;  %s73_s25 = int_to_ptr.vmem [resolvable:$true] %s72_s25 }
   0x9   :  { %v22_v10 = vld [vmem:[%s220_s1 + $0x28] sm:$0xff]  ;;  %v21_v11 = vld [vmem:[%s220_s1 + $0x20] sm:$0xff]  ;;  %v20_v12 = vld [vmem:[%s220_s1 + $0x18] sm:$0xff] }
   0xa   :  { %37 = vmatpush.msra.mxu0 %v28_v4  ;;  %90 = vmatpush.msra.mxu1 %v28_v4  ;;  %v19_v13 = vld [vmem:[%s220_s1 + $0x10] sm:$0xff]  ;;  %v18_v14 = vld [vmem:[%s220_s1 + $0x8] sm:$0xff]  ;;  %v17_v15 = vld [vmem:[%s220_s1] sm:$0xff] }
   0xb   :  { %v15_v16 = vld [vmem:[%s219_s0] sm:$0xff]  ;;  %v16_v17 = vld [vmem:[%s219_s0 + $0x8] sm:$0xff]  ;;  %s134_s0 = smov 128  }
   0xc   :  { %38 = vmatpush.msra.mxu0 %v27_v5  ;;  %91 = vmatpush.msra.mxu1 %v27_v5  ;;  %v105_v18 = vld [vmem:[%s221_s2] ss:$0 sm:$0xff]  ;;  %v106_v19 = vld [vmem:[%s221_s2 + $0x1] ss:$0 sm:$0xff] }
   0xe   :  { %39 = vmatpush.msra.mxu0 %v26_v6  ;;  %92 = vmatpush.msra.mxu1 %v26_v6 }
  0x10   :  { %40 = vmatpush.msra.mxu0 %v25_v7  ;;  %93 = vmatpush.msra.mxu1 %v25_v7 }
  0x12   :  { %41 = vmatpush.msra.mxu0 %v24_v8  ;;  %94 = vmatpush.msra.mxu1 %v24_v8 }
  0x14   :  { %42 = vmatpush.msra.mxu0 %v23_v9  ;;  %95 = vmatpush.msra.mxu1 %v23_v9 }
  0x16   :  { %43 = vmatpush.msra.mxu0 %v22_v10  ;;  %96 = vmatpush.msra.mxu1 %v22_v10 }
  0x18   :  { %44 = vmatpush.msra.mxu0 %v21_v11  ;;  %97 = vmatpush.msra.mxu1 %v21_v11 }
  0x1a   :  { %45 = vmatpush.msra.mxu0 %v20_v12  ;;  %98 = vmatpush.msra.mxu1 %v20_v12 }
  0x1c   :  { %46 = vmatpush.msra.mxu0 %v19_v13  ;;  %99 = vmatpush.msra.mxu1 %v19_v13 }
  0x1e   :  { %47 = vmatpush.msra.mxu0 %v18_v14  ;;  %100 = vmatpush.msra.mxu1 %v18_v14 }
  0x20   :  { %48 = vmatpush.msra.mxu0 %v17_v15  ;;  %101 = vmatpush.msra.mxu1 %v17_v15 }
  0x21   :  { %49 = vmatmul.f32.vlgmr.msra.gmra.mxu0 %v15_v16  ;;  %52 = vmatmul.f32.vlgmr.msra.gmra.mxu1 %v16_v17 }
  0x9e   :  { %v50_v20 = vpop.f32.mrf.mxu0  ;;  %v53_v21 = vpop.f32.mrf.mxu1 }
  0x9f   :  { %v64_v22 = vadd.f32 %v105_v18, %v50_v20  ;;  %v65_v23 = vadd.f32 %v106_v19, %v53_v21 }
  0xa1   :  { %66 = vst [vmem:[#allocation2] sm:$0xff] %v64_v22 }
  0xa2   :  { %67 = vst [vmem:[#allocation2 + $0x8] sm:$0xff] %v65_v23 }
  0xa3   :  { %80 = dma.vmem_to_hbm [thread:$0]  %s73_s25, 256, %s75_s28, [#allocation3], %s134_s0, %s134_s0, %s135_s29  }
  0xa4   :  { %131 = dma.done.wait [#allocation3], 256  }
  0xa5   :  { %132 = vsyncadd [#allocation3], 4294967040 }
  0xa6   :  { %85 = vsyncpa [#allocation3], 1 }

// kernel: perm_equi2_max.2
= control target key start
LH: loop header
LB: loop body
LE: loop exit
PB: predicated region body
PF: predicated region fallthrough
CT: control target
= control target key end

     0   :  { %v97_v2 = vmov -inf   ;;  %vm36_vm0 = vcmask 1041409   ;;  %s181_s1 = inlined_call_operand.vmem [shape: f32[128,128], index: 1, kind: input, shape index: {}]   ;;  %s182_s0 = inlined_call_operand.vmem [shape: f32[2,8,128], index: 0, kind: input, shape index: {}]   ;;  %s183_s2 = inlined_call_operand.vmem [shape: f32[1,128], index: 2, kind: input, shape index: {}]   ;;  %s184_s3 = inlined_call_operand.vmem [shape: f32[2,1,128], index: 3, kind: output, shape index: {}]  }
   0x1   :  { %v60_v0 = vld [vmem:[%s181_s1 + $0x78] sm:$0xff]  ;;  %v59_v1 = vld [vmem:[%s181_s1 + $0x70] sm:$0xff]  ;;  %18 = vst [vmem:[#allocation2] sm:$0x3] %v97_v2  ;;  %v58_v3 = vld [vmem:[%s181_s1 + $0x68] sm:$0xff] }
   0x2   :  { %61 = vmatpush.msra.mxu0 %v60_v0  ;;  %v57_v4 = vld [vmem:[%s181_s1 + $0x60] sm:$0xff]  ;;  %v21_v6 = vld [vmem:[%s182_s0 + $0x8] sm:$0xff]  ;;  %v56_v7 = vld [vmem:[%s181_s1 + $0x58] sm:$0xff] }
   0x3   :  { %v20_v5 = vld [vmem:[%s182_s0] sm:$0xff]  ;;  %v28_v9 = vrot.slane %v21_v6, 4  ;;  %v55_v10 = vld [vmem:[%s181_s1 + $0x50] sm:$0xff]  ;;  %v54_v13 = vld [vmem:[%s181_s1 + $0x48] sm:$0xff] }
   0x4   :  { %62 = vmatpush.msra.mxu0 %v59_v1  ;;  %v22_v8 = vrot.slane %v20_v5, 4  ;;  %v53_v16 = vld [vmem:[%s181_s1 + $0x40] sm:$0xff]  ;;  %v52_v19 = vld [vmem:[%s181_s1 + $0x38] sm:$0xff]  ;;  %v51_v22 = vld [vmem:[%s181_s1 + $0x30] sm:$0xff] }
   0x5   :  { %v29_v12 = vmax.f32 %v21_v6, %v28_v9  ;;  %v50_v26 = vld [vmem:[%s181_s1 + $0x28] sm:$0xff]  ;;  %v49_v29 = vld [vmem:[%s181_s1 + $0x20] sm:$0xff]  ;;  %v48_v30 = vld [vmem:[%s181_s1 + $0x18] sm:$0xff] }
   0x6   :  { %63 = vmatpush.msra.mxu0 %v58_v3  ;;  %v23_v11 = vmax.f32 %v20_v5, %v22_v8  ;;  %v47_v31 = vld [vmem:[%s181_s1 + $0x10] sm:$0xff]  ;;  %v46_v32 = vld [vmem:[%s181_s1 + $0x8] sm:$0xff]  ;;  %v45_v33 = vld [vmem:[%s181_s1] sm:$0xff] }
   0x7   :  { %v30_v15 = vrot.slane %v29_v12, 2  ;;  %v96_v35 = vld [vmem:[%s183_s2] ss:$0 sm:$0xff] }
   0x8   :  { %64 = vmatpush.msra.mxu0 %v57_v4  ;;  %v24_v14 = vrot.slane %v23_v11, 2  ;;  %v19_v23 = vld [vmem:[#allocation2] sm:$0x3] }
   0x9   :  { %v31_v18 = vmax.f32 %v29_v12, %v30_v15 }
   0xa   :  { %65 = vmatpush.msra.mxu0 %v56_v7  ;;  %v25_v17 = vmax.f32 %v23_v11, %v24_v14 }
   0xb   :  { %v32_v21 = vrot.slane %v31_v18, 1 }
   0xc   :  { %66 = vmatpush.msra.mxu0 %v55_v10  ;;  %v26_v20 = vrot.slane %v25_v17, 1 }
   0xd   :  { %v33_v25 = vmax.f32 %v31_v18, %v32_v21 }
   0xe   :  { %67 = vmatpush.msra.mxu0 %v54_v13  ;;  %v27_v24 = vmax.f32 %v25_v17, %v26_v20 }
  0x10   :  { %68 = vmatpush.msra.mxu0 %v53_v16  ;;  %v37_v27 = vsel %vm36_vm0, %v33_v25, %v27_v24 }
  0x11   :  { %v39_v28 = vmax.f32 %v19_v23, %v37_v27 }
  0x12   :  { %69 = vmatpush.msra.mxu0 %v52_v19 }
  0x13   :  { %40 = vst [vmem:[#allocation2] sm:$0x3] %v39_v28 }
  0x14   :  { %70 = vmatpush.msra.mxu0 %v51_v22 }
  0x16   :  { %71 = vmatpush.msra.mxu0 %v50_v26 }
  0x18   :  { %72 = vmatpush.msra.mxu0 %v49_v29 }
  0x1a   :  { %73 = vmatpush.msra.mxu0 %v48_v30  ;;  %v44_v34 = vld [vmem:[#allocation2] sm:$0x3] }
  0x1c   :  { %74 = vmatpush.msra.mxu0 %v47_v31 }
  0x1e   :  { %75 = vmatpush.msra.mxu0 %v46_v32 }
  0x20   :  { %76 = vmatpush.msra.mxu0 %v45_v33 }
  0x21   :  { %77 = vmatmul.f32.vlgmr.msra.gmra.mxu0 %v44_v34 }
  0x9e   :  { %v78_v36 = vpop.f32.mrf.mxu0 }
  0x9f   :  { %v85_v37 = vsub.f32 %v96_v35, %v78_v36 }
  0xa1   :  { %v87_v38 = vrot.slane %v85_v37, 1  ;;  %89 = vst [vmem:[%s184_s3] sm:$0x1] %v85_v37 }
  0xa3   :  { %90 = vst [vmem:[%s184_s3 + $0x1] sm:$0x1] %v87_v38 }

</bundles_post_ra>
